<compile_context>
chip_gen: v7x
topology: tpu7x:2x2x1
jax: 0.10.0
libtpu: 0.0.40
codegen_flags: <defaults>
</compile_context>

<pallas_src>
import jax
import jax.numpy as jnp
from jax.experimental import pallas as pl
from jax.experimental.pallas import tpu as pltpu


def _round_up(n, m):
    return -(-n // m) * m


def _fused_gcn_kernel(x_ref, w_ref, b_ref, o_ref, acc_ref):
    """One grid step of out2d = x2d @ W_comb + bias_row.

    x_ref:   (tm, tk)  rows = flattened (n, t), cols = flattened (v, c_in)
    w_ref:   (tk, tn)  W_comb tile: rows (v, c_in), cols (w, c_out)
    b_ref:   (1, tn)   folded bias row (f32)
    o_ref:   (tm, tn)  output tile, cols = flattened (w, c_out)
    acc_ref: (tm, tn)  f32 accumulator scratch (resident across the k axis)
    """
    @pl.when(pl.program_id(2) == 0)
    def _init():
        acc_ref[...] = jnp.zeros_like(acc_ref)

    acc_ref[...] += jnp.dot(x_ref[...], w_ref[...],
                            preferred_element_type=jnp.float32)

    @pl.when(pl.program_id(2) == pl.num_programs(2) - 1)
    def _finalize():
        o_ref[...] = (acc_ref[...] + b_ref[...]).astype(o_ref.dtype)


def _vmem_budgets():
    """Generation-aware VMEM sizing (v7x has 64 MiB/TC, v5e/v6e have 128 MiB)."""
    try:
        cap = int(pltpu.get_tpu_info().vmem_capacity_bytes)
    except Exception:
        cap = 64 << 20  # conservative default: v7x per-TensorCore VMEM
    ws_budget = min(cap // 4, 24 << 20)   # working-set budget for tile sizing
    vmem_limit = min(cap // 2, 48 << 20)  # scoped VMEM requested from Mosaic
    return ws_budget, vmem_limit


def _pick_tiles(M, Kd, Nd, itemsize, ws_budget, tile_cap=1024, tm_cap=512):
    """Tile sizes + padded extents for the (M, Nd, Kd) matmul grid."""
    pad128 = lambda n: _round_up(n, 128)
    tk = Kd if Kd <= tile_cap else tile_cap
    tn = Nd if Nd <= tile_cap else tile_cap
    Kd_pad = _round_up(Kd, tk)
    N_pad = _round_up(Nd, tn)
    # Working set: W tile + bias (double-buffered) is fixed; x tile, out tile
    # (double-buffered) and the f32 accumulator scale with tm.
    fixed = 2 * _round_up(tk, 8) * pad128(tn) * itemsize + 2 * 8 * pad128(tn) * 4
    per_row = (2 * pad128(tk) + 2 * pad128(tn)) * itemsize + pad128(tn) * 4
    tm = (ws_budget - fixed) // max(per_row, 1)
    tm = max(8, min(int(tm), tm_cap))
    # Keep >= 2 blocks along M so both v7x TensorCores get work and the
    # pipeline has more than one step.
    tm = min(tm, max(8, _round_up(-(-M // 2), 8)))
    tm = max(8, (tm // 8) * 8)
    M_pad = _round_up(max(M, 1), tm)
    return tm, tk, tn, M_pad, Kd_pad, N_pad


def conv_temporal_graphical(x, A, weight, bias, *, channels_last=False,
                            compute_dtype=None):
    """ST-GCN spatial graph conv (default 1x1 temporal kernel).

    x:      (N, C_in, T, V)   or (N, T, V, C_in) if channels_last=True
    A:      (K, V, V)
    weight: (K, C_out, C_in)  (nn.Conv2d weight (K*C_out, C_in, 1, 1) reshaped)
    bias:   (K*C_out,)
    Returns (out, A) with out (N, C_out, T, V) (or (N, T, V, C_out)).
    """
    if channels_last:
        Nb, T, V, C_in = x.shape
        x_ct = x
    else:
        Nb, C_in, T, V = x.shape
        # TODO(synk): accept channel-last activations end-to-end (use
        # channels_last=True) to remove this extra HBM pass.
        x_ct = jnp.transpose(x, (0, 2, 3, 1))
    K, C_out, _ = weight.shape
    assert A.shape == (K, V, V)
    assert bias.shape == (K * C_out,)

    M = Nb * T
    Kd = V * C_in    # contraction dim of the fused matmul
    Nd = V * C_out   # output-column dim of the fused matmul

    if compute_dtype is None:
        compute_dtype = x.dtype
    compute_dtype = jnp.dtype(compute_dtype)
    itemsize = compute_dtype.itemsize

    # Fold the K graph kernels and the 1x1 conv into one combined weight:
    #   W_comb[(v, c), (w, o)] = sum_k A[k, v, w] * weight[k, o, c]
    w_comb = jnp.einsum('kvw,koc->vcwo',
                        A.astype(jnp.float32), weight.astype(jnp.float32))
    w_comb = w_comb.reshape(Kd, Nd).astype(compute_dtype)
    # Fold the conv bias through the graph aggregation (kept in f32):
    #   bias_row[(w, o)] = sum_k bias[k, o] * sum_v A[k, v, w]
    a_colsum = jnp.sum(A.astype(jnp.float32), axis=1)                # (K, V)
    bias_row = jnp.einsum('kw,ko->wo', a_colsum,
                          bias.astype(jnp.float32).reshape(K, C_out))
    bias_row = bias_row.reshape(1, Nd)

    x2d = x_ct.reshape(M, Kd).astype(compute_dtype)

    ws_budget, vmem_limit = _vmem_budgets()
    tm, tk, tn, M_pad, Kd_pad, N_pad = _pick_tiles(M, Kd, Nd, itemsize, ws_budget)

    if (M_pad, Kd_pad) != (M, Kd):
        x2d = jnp.pad(x2d, ((0, M_pad - M), (0, Kd_pad - Kd)))
    if (Kd_pad, N_pad) != (Kd, Nd):
        w_comb = jnp.pad(w_comb, ((0, Kd_pad - Kd), (0, N_pad - Nd)))
    if N_pad != Nd:
        bias_row = jnp.pad(bias_row, ((0, 0), (0, N_pad - Nd)))

    grid = (M_pad // tm, N_pad // tn, Kd_pad // tk)

    out_itemsize = jnp.dtype(x.dtype).itemsize
    cost = pl.CostEstimate(
        flops=2 * M * Kd * Nd,
        transcendentals=0,
        bytes_accessed=int(x2d.size * itemsize + w_comb.size * itemsize
                           + bias_row.size * 4 + M * Nd * out_itemsize))

    out2d = pl.pallas_call(
        _fused_gcn_kernel,
        out_shape=jax.ShapeDtypeStruct((M_pad, N_pad), x.dtype),
        grid_spec=pltpu.PrefetchScalarGridSpec(
            num_scalar_prefetch=0,
            grid=grid,
            in_specs=[
                pl.BlockSpec((tm, tk), lambda i, j, k: (i, k)),
                pl.BlockSpec((tk, tn), lambda i, j, k: (k, j)),
                pl.BlockSpec((1, tn), lambda i, j, k: (0, j)),
            ],
            out_specs=pl.BlockSpec((tm, tn), lambda i, j, k: (i, j)),
            scratch_shapes=[pltpu.VMEM((tm, tn), jnp.float32)],
        ),
        compiler_params=pltpu.CompilerParams(
            dimension_semantics=("parallel", "parallel", "arbitrary"),
            vmem_limit_bytes=int(vmem_limit)),
        cost_estimate=cost,
    )(x2d, w_comb, bias_row)

    out_ct = out2d[:M, :Nd].reshape(Nb, T, V, C_out)
    if channels_last:
        return out_ct, A
    out = out_ct.transpose(0, 3, 1, 2)   # (N, C_out, T, V)
    return out, A


def _reference(x, A, weight, bias):
    # Pure-JAX reference mirroring the PyTorch forward.
    N, C_in, T, V = x.shape
    K, C_out, _ = weight.shape
    w2d = weight.reshape(K * C_out, C_in)
    y = jnp.einsum('oc,nctv->notv', w2d, x) + bias.reshape(1, K * C_out, 1, 1)
    y = y.reshape(N, K, C_out, T, V)
    return jnp.einsum('nkctv,kvw->nctw', y, A)


if __name__ == "__main__":
    # Small shapes consistent with the module's forward.
    N, C_in, T, V = 2, 4, 8, 16
    C_out, K = 8, 3

    key = jax.random.PRNGKey(0)
    kx, ka, kw, kb = jax.random.split(key, 4)
    x = jax.random.normal(kx, (N, C_in, T, V), dtype=jnp.float32)
    A = jax.random.normal(ka, (K, V, V), dtype=jnp.float32)
    # Parameter shapes follow nn.Conv2d(C_in, C_out*K, (1, 1)).
    weight = jax.random.normal(kw, (K, C_out, C_in), dtype=jnp.float32) * 0.1
    bias = jax.random.normal(kb, (K * C_out,), dtype=jnp.float32) * 0.1

    out, A_out = conv_temporal_graphical(x, A, weight, bias)
    out = jax.block_until_ready(out)

    ref = _reference(x, A, weight, bias)
    assert out.shape == (N, C_out, T, V)
    assert jnp.allclose(out, ref, atol=1e-4, rtol=1e-4), "mismatch vs reference"
    assert jnp.array_equal(A_out, A)

    print("KERNEL_OK")
</pallas_src>

<mosaic_0001>
module attributes {stable_mosaic.version = 11 : i64} {
  func.func @_fused_gcn_kernel(%arg0: i32, %arg1: i32, %arg2: i32, %arg3: memref<8x64xf32, #tpu.memory_space<vmem>>, %arg4: memref<64x128xf32, #tpu.memory_space<vmem>>, %arg5: memref<1x128xf32, #tpu.memory_space<vmem>>, %arg6: memref<8x128xf32, #tpu.memory_space<vmem>>, %arg7: memref<8x128xf32, #tpu.memory_space<vmem>>) attributes {dimension_semantics = [#tpu.dimension_semantics<parallel>, #tpu.dimension_semantics<parallel>, #tpu.dimension_semantics<arbitrary>], iteration_bounds = array<i64: 2, 1, 1>, scalar_prefetch = 0 : i64, scratch_operands = 1 : i64, tpu.core_type = #tpu.core_type<tc>, window_params = [{transform_indices = @transform_0, window_bounds = array<i64: 8, 64>}, {transform_indices = @transform_1, window_bounds = array<i64: 64, 128>}, {transform_indices = @transform_2, window_bounds = array<i64: 1, 128>}, {transform_indices = @transform_3, window_bounds = array<i64: 8, 128>}]} {
    %c0_i32 = arith.constant 0 : i32
    %0 = arith.cmpi eq, %arg2, %c0_i32 : i32
    %1 = arith.extui %0 : i1 to i32
    %c0_i32_0 = arith.constant 0 : i32
    %2 = arith.cmpi ne, %1, %c0_i32_0 : i32
    scf.if %2 {
      %cst_10 = arith.constant 0.000000e+00 : f32
      %12 = vector.broadcast %cst_10 : f32 to vector<8x128xf32>
      %c0_11 = arith.constant 0 : index
      %c0_12 = arith.constant 0 : index
      %13 = vector.load %arg7[%c0_11, %c0_12] : memref<8x128xf32, #tpu.memory_space<vmem>>, vector<8x128xf32>
      tpu.vector_store %arg7[%c0_11, %c0_12], %12 {strides = array<i32>} : memref<8x128xf32, #tpu.memory_space<vmem>>, vector<8x128xf32>,
    } else {
    }
    %c0 = arith.constant 0 : index
    %c0_1 = arith.constant 0 : index
    %3 = vector.load %arg7[%c0, %c0_1] : memref<8x128xf32, #tpu.memory_space<vmem>>, vector<8x128xf32>
    %c0_2 = arith.constant 0 : index
    %c0_3 = arith.constant 0 : index
    %4 = vector.load %arg3[%c0_2, %c0_3] : memref<8x64xf32, #tpu.memory_space<vmem>>, vector<8x64xf32>
    %c0_4 = arith.constant 0 : index
    %c0_5 = arith.constant 0 : index
    %5 = vector.load %arg4[%c0_4, %c0_5] : memref<64x128xf32, #tpu.memory_space<vmem>>, vector<64x128xf32>
    %cst = arith.constant dense<0.000000e+00> : vector<8x128xf32>
    %6 = tpu.matmul %4, %5, %cst {dimension_numbers = #tpu.dot_dimension_numbers<[1], [0], [0], [1], [0, 0, 1, 1], [], []>} : vector<8x64xf32>, vector<64x128xf32>, vector<8x128xf32> -> vector<8x128xf32>
    %7 = arith.addf %3, %6 : vector<8x128xf32>
    %c0_6 = arith.constant 0 : index
    %c0_7 = arith.constant 0 : index
    %8 = vector.load %arg7[%c0_6, %c0_7] : memref<8x128xf32, #tpu.memory_space<vmem>>, vector<8x128xf32>
    tpu.vector_store %arg7[%c0_6, %c0_7], %7 {strides = array<i32>} : memref<8x128xf32, #tpu.memory_space<vmem>>, vector<8x128xf32>,
    %c0_i32_8 = arith.constant 0 : i32
    %9 = arith.cmpi eq, %arg2, %c0_i32_8 : i32
    %10 = arith.extui %9 : i1 to i32
    %c0_i32_9 = arith.constant 0 : i32
    %11 = arith.cmpi ne, %10, %c0_i32_9 : i32
    scf.if %11 {
      %c0_10 = arith.constant 0 : index
      %c0_11 = arith.constant 0 : index
      %12 = vector.load %arg7[%c0_10, %c0_11] : memref<8x128xf32, #tpu.memory_space<vmem>>, vector<8x128xf32>
      %c0_12 = arith.constant 0 : index
      %c0_13 = arith.constant 0 : index
      %13 = vector.load %arg5[%c0_12, %c0_13] : memref<1x128xf32, #tpu.memory_space<vmem>>, vector<1x128xf32>
      %14 = vector.broadcast %13 : vector<1x128xf32> to vector<8x128xf32>
      %15 = arith.addf %12, %14 : vector<8x128xf32>
      %c0_14 = arith.constant 0 : index
      %c0_15 = arith.constant 0 : index
      %16 = vector.load %arg6[%c0_14, %c0_15] : memref<8x128xf32, #tpu.memory_space<vmem>>, vector<8x128xf32>
      tpu.vector_store %arg6[%c0_14, %c0_15], %15 {strides = array<i32>} : memref<8x128xf32, #tpu.memory_space<vmem>>, vector<8x128xf32>,
    } else {
    }
    return
  }
  func.func @transform_0(%arg0: i32, %arg1: i32, %arg2: i32) -> (i32, i32) {
    %c0_i32 = arith.constant 0 : i32
    return %arg0, %arg2 : i32, i32
  }
  func.func @transform_1(%arg0: i32, %arg1: i32, %arg2: i32) -> (i32, i32) {
    %c0_i32 = arith.constant 0 : i32
    return %arg2, %arg1 : i32, i32
  }
  func.func @transform_2(%arg0: i32, %arg1: i32, %arg2: i32) -> (i32, i32) {
    %c0_i32 = arith.constant 0 : i32
    %c0_i32_0 = arith.constant 0 : i32
    return %c0_i32, %arg1 : i32, i32
  }
  func.func @transform_3(%arg0: i32, %arg1: i32, %arg2: i32) -> (i32, i32) {
    %c0_i32 = arith.constant 0 : i32
    return %arg0, %arg1 : i32, i32
  }
}

</mosaic_0001>

<bundles_post_ra>
// kernel: tpu_custom_call.1
= control target key start
LH: loop header
LB: loop body
LE: loop exit
PB: predicated region body
PF: predicated region fallthrough
CT: control target
= control target key end

     0   :  { %8 = vsyncpa [#allocation4], 0  ;;  %s1010_s0 = inlined_call_operand.hbm [shape: f32[16,64], index: 0, kind: input, shape index: {}]   ;;  %s1011_s1 = inlined_call_operand.hbm [shape: f32[64,128], index: 1, kind: input, shape index: {}]   ;;  %s1012_s2 = inlined_call_operand.vmem [shape: f32[1,128], index: 2, kind: input, shape index: {}]   ;;  %s1013_s3 = inlined_call_operand.hbm [shape: f32[16,128], index: 3, kind: output, shape index: {}]  }
   0x1   :  { %10 = vsyncpa [#allocation4 + $0x1], 0 }
   0x2   :  { %11 = vsyncpa [#allocation7], 0 }
   0x3   :  { %12 = vsyncpa [#allocation5], 0 }
   0x4   :  { %14 = vsyncpa [#allocation5 + $0x1], 0  ;;  %s789_s12 = smov 0   ;;  %s791_s13 = smov 0  }
   0x5   :  { %s793_s14 = smov 0   ;;  %s795_s15 = smov 0  }
   0x6   :  { %s797_s16 = smov 0   ;;  %s799_s17 = smov 0  }
   0x7 LB: > { %s479_s18 = sadd.s32 4294967295, %s759_s17   ;;  %s480_s19 = sadd.s32 4294967294, %s759_s17   ;;  %s759_s17 = sphi %s799_s17, %s20_s17   ;;  %s755_s16 = sphi %s797_s16, %s1037_s16   ;;  %s751_s15 = sphi %s795_s15, %s1036_s15   ;;  %s747_s14 = sphi %s793_s14, %s1035_s14   ;;  %s743_s13 = sphi %s791_s13, %s1034_s13   ;;  %s739_s12 = sphi %s789_s12, %s1033_s12  }
   0x8   : > { %p61_p0 = scmp.ne.s32.totalorder %s743_s13, %s739_s12  ;;  %p823_p1 = scmp.eq.s32.totalorder %s479_s18, 0 }
   0x9   : > { %p827_p2 = scmp.eq.s32.totalorder %s479_s18, 1  ;;  %p147_p3 = scmp.eq.s32.totalorder %s480_s19, 1 }
   0xa   : > { %s1018_s20 = scalar_select %p823_p1, 1, 0 }
   0xb   : > { %s1019_s21 = scalar_select %p827_p2, 1, 0 }
   0xc   : > { %p833_p4 = por %p823_p1, %p61_p0  ;;  %p481_p5 = scmp.ge.s32.totalorder %s759_s17, 1 }
   0xd   : > { %p838_p6 = por %p147_p3, %p61_p0  ;;  %p154_p7 = scmp.lt.s32.totalorder %s759_s17, 3 }
   0xe   : > { %s1020_s22 = scalar_select %p833_p4, 1, 0 }
   0xf   : > { %s1021_s23 = scalar_select %p838_p6, 1, 0 }
  0x10   : > { %p843_p8 = pnand %p481_p5, %p154_p7  ;;  %s761_s25 = smov [#allocation6]  }
  0x11   : > { %s170_s26 = sshll.u32 %s761_s25, 4  ;;  %s39_s28 = sadd.s32 1, %s755_s16  ;;  %s171_s26 = int_to_ptr.vmem [resolvable:$true] %s170_s26 }
  0x12   : > { %s1022_s24 = scalar_select %p843_p8, 1, 0 }
  0x13   : > { %p545_p9 = pneg %p843_p8  ;;  %s615_s4 = scalar_lea.hbm %s1011_s1, 1024 }
  0x14   : > { %p616_p12 = scmp.ne.s32.totalorder %s1011_s1, %s615_s4  ;;  %p622_p5 = scmp.lt.u32.totalorder %s615_s4, %s1011_s1 }
  0x15   : > { %p852_p11 = pnand %p545_p9, %p823_p1 }
  0x17   : > { %p617_p13 = pneg %p852_p11 }
  0x19   : > { %p618_p0 = pnand %p617_p13, %p616_p12 }
  0x1b   : > { %p619_p3 = pneg %p618_p0 }
  0x1d   : > { %p624_p7 = pnand %p622_p5, %p619_p3 }
  0x1f   : > { %627 = shalt.err (!%p624_p7)
}
  0x20   : > { %s628_s9 = scalar_lea.vmem %s171_s26, 1024  ;;  %p636_p1 = scmp.lt.s32.totalorder %s171_s26, %s171_s26 }
  0x21   : > { %p629_p9 = scmp.ne.s32.totalorder %s171_s26, %s628_s9  ;;  %p637_p4 = scmp.lt.s32.totalorder %s628_s9, %s628_s9 }
  0x23   : > { %p631_p10 = pnand %p629_p9, %p617_p13  ;;  %p638_p8 = por %p637_p4, %p636_p1 }
  0x25   : > { %p632_p6 = pneg %p631_p10 }
  0x27   : > { %p639_p2 = pnand %p638_p8, %p632_p6 }
  0x29   : > { %642 = shalt.err (!%p639_p2)
}
  0x2a   : > { %s762_s10 = smov 128   ;;  %s763_s11 = smov 8  }
  0x2b   : > { %548 = dma.hbm_to_vmem [thread:$0]  (!%p852_p11), %s1011_s1, 1024, %s171_s26, [#allocation7], %s762_s10, %s762_s10, %s763_s11  }
  0x2c   : > { %p41_p1 = scmp.ge.s32.totalorder %s39_s28, 2  ;;  %s48_s25 = sadd.s32 1, %s747_s14 }
  0x2d   : > { %p55_p2 = scmp.ne.s32.totalorder %s747_s14, %s743_s13  ;;  %p56_p4 = scmp.eq.s32.totalorder %s759_s17, 0 }
  0x2e   : > { %s1039_s28 = smov (%p41_p1, %s39_s28), 0  ;;  %p1025_p8 = scmp.ne.s32.totalorder %s1019_s21, 0 }
  0x2f   : > { %p879_p6 = por %p56_p4, %p55_p2  ;;  %s43_s27 = ssub.s32 %s755_s16, %s1039_s28 }
  0x30   : > { %p885_p10 = por %p1025_p8, %p55_p2  ;;  %p558_p12 = scmp.lt.s32.totalorder %s759_s17, 2 }
  0x31   : > { %p46_p11 = scmp.eq.s32.totalorder %s43_s27, 0  ;;  %s190_s26 = sand.u32 1, %s747_s14  }
  0x32   : > { %s485_s4 = sshll.u32 %s190_s26, 3  ;;  %s486_s6 = sshll.u32 %s755_s16, 7 }
  0x33   : > { %s894_s5 = scalar_select %p46_p11, %s747_s14, %s48_s25  }
  0x34   : > { %s900_s9 = scalar_lea.hbm %s1010_s0, %s486_s6  ;;  %s194_s21 = scalar_lea.vmem [#allocation3], %s485_s4 }
  0x35   : > { %s202_s10 = sshll.u32 %s194_s21, 4  ;;  %p906_p13 = pnand %p558_p12, %p879_p6  ;;  %s902_s10 = int_to_ptr.vmem [resolvable:$true] %s202_s10 }
  0x36   : > { %s191_s18 = scalar_lea.sflag [#allocation4], %s190_s26  ;;  %s643_s19 = scalar_lea.hbm %s900_s9, 128 }
  0x37   : > { %p644_p0 = scmp.ne.s32.totalorder %s900_s9, %s643_s19  ;;  %p645_p3 = pneg %p906_p13 }
  0x38   : > { %s648_s4 = scalar_lea.hbm %s1010_s0, 256  ;;  %p649_p9 = scmp.lt.u32.totalorder %s900_s9, %s1010_s0 }
  0x39   : > { %p646_p5 = pnand %p645_p3, %p644_p0  ;;  %p650_p1 = scmp.lt.u32.totalorder %s648_s4, %s643_s19 }
  0x3a   : > { %p652_p4 = scmp.lt.u32.totalorder %s643_s19, %s900_s9 }
  0x3b   : > { %p647_p7 = pneg %p646_p5  ;;  %p651_p2 = por %p650_p1, %p649_p9 }
  0x3d   : > { %p653_p6 = por %p652_p4, %p651_p2 }
  0x3f   : > { %p654_p8 = pnand %p653_p6, %p647_p7 }
  0x41   : > { %657 = shalt.err (!%p654_p8)
}
  0x42   : > { %s658_s26 = scalar_lea.vmem %s902_s10, 128  ;;  %s764_s7 = smov [#allocation3]  }
  0x43   : > { %p659_p12 = scmp.ne.s32.totalorder %s902_s10, %s658_s26  ;;  %s663_s8 = sshll.u32 %s764_s7, 4  ;;  %s664_s8 = int_to_ptr.vmem [resolvable:$false] %s663_s8 }
  0x44   : > { %s665_s21 = scalar_lea.vmem %s664_s8, 256  ;;  %p666_p5 = scmp.lt.s32.totalorder %s902_s10, %s664_s8 }
  0x45   : > { %p661_p11 = pnand %p659_p12, %p645_p3  ;;  %p667_p9 = scmp.lt.s32.totalorder %s665_s21, %s658_s26 }
  0x47   : > { %p662_p0 = pneg %p661_p11  ;;  %p668_p1 = por %p667_p9, %p666_p5 }
  0x49   : > { %p669_p2 = pnand %p668_p1, %p662_p0 }
  0x4b   : > { %672 = shalt.err (!%p669_p2)
}
  0x4c   : > { %552 = dma.hbm_to_vmem [thread:$0]  (!%p906_p13), %s900_s9, 128, %s902_s10, %s191_s18  }
  0x4d   : > { %p1028_p7 = scmp.ne.s32.totalorder %s1022_s24, 0 }
  0x4e   : > { %s938_s19 = sand.u32 (!%p1028_p7), 1, %s743_s13   ;;  %p1029_p3 = scmp.ne.s32.totalorder (!%p1028_p7), %s1020_s22, 0 }
  0x4f   : > { %211 = sbr.rel (%p1028_p7) target bundleno = 337 (0x151), region = 32  ;;  %s488_s25 = sshll.u32 (!%p1028_p7), %s938_s19, 3 }
  0x50   : > { %s214_s27 = scalar_lea.sflag (!%p1028_p7), [#allocation4], %s938_s19  ;;  %s217_s4 = scalar_lea.vmem (!%p1028_p7), [#allocation3], %s488_s25 }
  0x56   : > { %726 = dma.done.wait (%p1029_p3), %s214_s27, 128  }
  0x57   : > { %728 = vsyncadd (%p1029_p3), %s214_s27, 4294967168  ;;  %p1030_p13 = scmp.ne.s32.totalorder %s1018_s20, 0 }
  0x59   : > { %730 = dma.done.wait (%p1030_p13), [#allocation7], 1024  }
  0x5a   : > { %732 = vsyncadd (%p1030_p13), [#allocation7], 4294966272  ;;  %v765_v0 = vmov 0.0|0.0   ;;  %vm766_vm0 = vmmov 0   ;;  %v767_v1 = vmov 0.0   ;;  %v258_v2 = vld [vmem:[#allocation6] sm:$0xff] }
  0x5b   : > { %525 = vmatprep.subr.bf16.mxu0 %v765_v0  ;;  %522 = vmatprep.mubr.msk.f32.mxu0 %vm766_vm0, %v767_v1  ;;  %v259_v3 = vld [vmem:[#allocation6 + $0x8] sm:$0xff]  ;;  %v260_v4 = vld [vmem:[#allocation6 + $0x10] sm:$0xff]  ;;  %v261_v6 = vld [vmem:[#allocation6 + $0x18] sm:$0xff]  ;;  %vm266_vm1 = vcmask 523264   ;;  %s494_s24 = sshll.u32 %s751_s15, 7  ;;  %s246_s9 = scalar_lea.vmem [#allocation8], %s488_s25 }
  0x5c   : > { %v526_v5 = vpack.c.bf16 %v259_v3, %v258_v2  ;;  %v529_v7 = vpack.c.bf16 %v261_v6, %v260_v4  ;;  %v262_v8 = vld [vmem:[#allocation6 + $0x20] sm:$0xff]  ;;  %v263_v9 = vld [vmem:[#allocation6 + $0x28] sm:$0xff]  ;;  %v264_v11 = vld [vmem:[#allocation6 + $0x30] sm:$0xff]  ;;  %s370_s10 = sshll.u32 %s246_s9, 4  ;;  %s961_s29 = scalar_lea.hbm %s1013_s3, %s494_s24  ;;  %s963_s10 = int_to_ptr.vmem [resolvable:$true] %s370_s10 }
  0x5d   : > { %v532_v10 = vpack.c.bf16 %v263_v9, %v262_v8  ;;  %v265_v12 = vld [vmem:[#allocation6 + $0x38] sm:$0xff]  ;;  %v492_v15 = vld [vmem:[%s1012_s2] ss:$0 sm:$0xff]  ;;  %s356_s6 = scalar_lea.sflag [#allocation5], %s938_s19  ;;  %s673_s26 = scalar_lea.vmem %s963_s10, 128 }
  0x5e   : > { %527 = vmatpush3.bf16.msra.mxu0 %v526_v5  ;;  %v535_v13 = vpack.c.bf16 %v265_v12, %v264_v11  ;;  %v257_v14 = vld [vmem:[%s217_s4] sm:$0xff]  ;;  %p674_p4 = scmp.ne.s32.totalorder %s963_s10, %s673_s26  ;;  %s768_s15 = smov [#allocation8]  }
  0x5f   : > { %528 = vmatprep.subr.bf16.mxu0 %v765_v0  ;;  %s677_s7 = sshll.u32 %s768_s15, 4  ;;  %s678_s7 = int_to_ptr.vmem [resolvable:$false] %s677_s7 }
  0x60   : > { %p675_p6 = pnand %p674_p4, %p885_p10  ;;  %s679_s8 = scalar_lea.vmem %s678_s7, 256 }
  0x61   : > { %p680_p12 = scmp.lt.s32.totalorder %s963_s10, %s678_s7  ;;  %p681_p11 = scmp.lt.s32.totalorder %s679_s8, %s673_s26 }
  0x62   : > { %530 = vmatpush3.bf16.msra.mxu0 %v529_v7  ;;  %p676_p8 = pneg %p675_p6 }
  0x63   : > { %531 = vmatprep.subr.bf16.mxu0 %v765_v0  ;;  %p682_p0 = por %p681_p11, %p680_p12 }
  0x65   : > { %p683_p5 = pnand %p682_p0, %p676_p8 }
  0x66   : > { %533 = vmatpush3.bf16.msra.mxu0 %v532_v10 }
  0x67   : > { %534 = vmatprep.subr.bf16.mxu0 %v765_v0 }
  0x6a   : > { %536 = vmatpush3.bf16.msra.mxu0 %v535_v13 }
  0x6d   : > { %523 = vmatmul.mubr.msk.f32.vlgmr.msra.gmra.mrb[0].mxu0 %vm266_vm1, %v257_v14 }
 0x140   : > { %v336_v16 = vpop.f32.mrb[0].mxu0 }
 0x141   : > { %v353_v17 = vadd.f32 %v492_v15, %v336_v16  ;;  %v524_v18 = vpop.f32.mrb[1].mxu0 }
 0x143   : > { %354 = vst [vmem:[%s246_s9] sm:$0xff] %v353_v17 }
 0x144   : > { %686 = shalt.err (!%p683_p5)
}
 0x145   : > { %s687_s21 = scalar_lea.hbm %s961_s29, 128  ;;  %s691_s27 = scalar_lea.hbm %s1013_s3, 256 }
 0x146   : > { %p688_p9 = scmp.ne.s32.totalorder %s961_s29, %s687_s21  ;;  %p692_p7 = scmp.lt.u32.totalorder %s961_s29, %s1013_s3 }
 0x147   : > { %p693_p3 = scmp.lt.u32.totalorder %s691_s27, %s687_s21  ;;  %p695_p4 = scmp.lt.u32.totalorder %s687_s21, %s961_s29 }
 0x148   : > { %p689_p1 = pnand %p688_p9, %p885_p10 }
 0x149   : > { %p694_p13 = por %p693_p3, %p692_p7 }
 0x14a   : > { %p690_p2 = pneg %p689_p1 }
 0x14b   : > { %p696_p6 = por %p695_p4, %p694_p13 }
 0x14d   : > { %p697_p8 = pnand %p696_p6, %p690_p2 }
 0x14f   : > { %700 = shalt.err (!%p697_p8)
}
 0x150   : > { %543 = dma.vmem_to_hbm [thread:$0]  (%p885_p10), %s963_s10, 128, %s961_s29, %s356_s6  }
 0x151 PF: > { %s382_s22 = sand.u32 1, %s739_s12   ;;  %p1031_p12 = scmp.ne.s32.totalorder %s1021_s23, 0 }
 0x152   : > { %p1032_p11 = scmp.ge.s32.totalorder %s759_s17, 2  ;;  %s383_s24 = scalar_lea.sflag [#allocation5], %s382_s22 }
 0x154   : > { %p554_p0 = pnand %p1032_p11, %p1031_p12 }
 0x156   : > { %734 = dma.done.wait (!%p554_p0), %s383_s24, 128  }
 0x157   : > { %736 = vsyncadd (!%p554_p0), %s383_s24, 4294967168  ;;  %s20_s17 = sadd.s32 1, %s759_s17   ;;  %s1033_s12 = smov %s743_s13 }
 0x158   : > { %p17_p5 = scmp.ge.s32.totalorder %s20_s17, 4   ;;  %s1034_s13 = smov %s747_s14 }
 0x159   : > { %s1035_s14 = smov %s894_s5  ;;  %s1036_s15 = smov %s755_s16 }
 0x15a   : > { %s1037_s16 = smov %s1039_s28  ;;  %19 = sbr.rel (!%p17_p5) target bundleno = 7 (0x7), region = 93 }
 0x161   :  { %388 = vsyncpa [#allocation4], 1 }
 0x162   :  { %390 = vsyncpa [#allocation4 + $0x1], 1 }
 0x163   :  { %391 = vsyncpa [#allocation7], 1 }
 0x164   :  { %392 = vsyncpa [#allocation5], 1 }
 0x165   :  { %394 = vsyncpa [#allocation5 + $0x1], 1 }

</bundles_post_ra>
